<compile_context>
chip_gen: v5e
topology: v5e:2x2
jax: 0.10.0
libtpu: 0.0.40
codegen_flags: <defaults>
</compile_context>

<pallas_src>
import functools

import jax
import jax.numpy as jnp
from jax import lax
from jax.experimental import pallas as pl
from jax.experimental.pallas import tpu as pltpu


def _clip_attention_kernel(x_ref, wqkv_ref, bqkv_ref, wo_ref, bo_ref, out_ref,
                           *, num_heads, scale):
    """One batch element of CLIP self-attention (no masks, dropout = 0).

    x_ref    : (1, T, E)  current batch element
    wqkv_ref : (E, 3E)    fused [q|k|v] projection weights ([in, out]), VMEM-resident
    bqkv_ref : (1, 3E)    fused projection bias
    wo_ref   : (E, E)     out-projection weight ([in, out]), VMEM-resident
    bo_ref   : (1, E)     out-projection bias
    out_ref  : (1, T, E)  output block
    """
    dt = x_ref.dtype
    x = x_ref[0]                                              # (T, E) native dtype
    T, E = x.shape
    H = num_heads
    D = E // H

    # Single E-wide fused QKV projection on the MXU: native-dtype operands,
    # f32 accumulation via preferred_element_type.
    qkv = (jnp.dot(x, wqkv_ref[...], preferred_element_type=jnp.float32)
           + bqkv_ref[...].astype(jnp.float32))               # (T, 3E) f32

    q = qkv[:, :E] * scale                                    # (T, E) f32
    k = qkv[:, E:2 * E]                                       # (T, E) f32
    v = qkv[:, 2 * E:]                                        # (T, E) f32

    # Per-head attention core.  The contraction depth D is inherent to the
    # attention math; H is a small static constant and at this size each head's
    # tensors live in a handful of vregs.
    # TODO(synk): for large T (e.g. ViT T=577) add a query-tile grid axis so the
    # (Tq, T) scores stay near the vreg file and v7x's second TC gets work at B=1.
    o_heads = []
    for h in range(H):
        qh = q[:, h * D:(h + 1) * D].astype(dt)               # (T, D)
        kh = k[:, h * D:(h + 1) * D].astype(dt)               # (T, D)
        vh = v[:, h * D:(h + 1) * D].astype(dt)               # (T, D)

        # Scores: contract head_dim of q with head_dim of k (no materialized k.T).
        s = lax.dot_general(qh, kh, (((1,), (1,)), ((), ())),
                            preferred_element_type=jnp.float32)   # (T, T)

        # Numerically-stable softmax over src_len (exact divide).
        s = s - jnp.max(s, axis=-1, keepdims=True)
        p = jnp.exp(s)
        p = p / jnp.sum(p, axis=-1, keepdims=True)
        # TODO(synk): attention dropout omitted (config.attention_dropout == 0.0
        # and eval-mode dropout is the identity anyway).

        o_heads.append(jnp.dot(p.astype(dt), vh,
                               preferred_element_type=jnp.float32))  # (T, D)

    # Head concat -> one E-wide out-projection matmul.
    o_cat = jnp.concatenate(o_heads, axis=-1)                 # (T, E) f32
    out = (jnp.dot(o_cat.astype(dt), wo_ref[...],
                   preferred_element_type=jnp.float32)
           + bo_ref[...].astype(jnp.float32))                 # (T, E) f32
    out_ref[0] = out.astype(out_ref.dtype)


def clip_attention(hidden_states, params, *, num_heads):
    """hidden_states: (B, T, E). Weights stored as [in, out], biases as (1, out)."""
    B, T, E = hidden_states.shape
    H = num_heads
    assert E % H == 0, "embed_dim must be divisible by num_heads"
    D = E // H
    scale = D ** (-0.5)

    # Trace-time fusion of q/k/v into one stacked (E, 3E) weight / (1, 3E) bias.
    wqkv = jnp.concatenate([params["wq"], params["wk"], params["wv"]], axis=1)
    bqkv = jnp.concatenate([params["bq"], params["bk"], params["bv"]], axis=1)
    wo = params["wo"]                                         # (E, E)
    bo = params["bo"]                                         # (1, E)

    kernel = functools.partial(_clip_attention_kernel, num_heads=H, scale=scale)

    # Weights/biases use constant index maps so their blocks stay resident in
    # VMEM across the whole (B,) grid instead of being re-DMA'd per step.
    # TODO(synk): for very large CLIP variants on v7x (64 MiB VMEM), resident
    # f32 weights may need to be cast to bf16 or streamed in head-group tiles.
    x_spec = pl.BlockSpec((1, T, E), lambda b: (b, 0, 0))
    wqkv_spec = pl.BlockSpec((E, 3 * E), lambda b: (0, 0))
    bqkv_spec = pl.BlockSpec((1, 3 * E), lambda b: (0, 0))
    wo_spec = pl.BlockSpec((E, E), lambda b: (0, 0))
    bo_spec = pl.BlockSpec((1, E), lambda b: (0, 0))
    out_spec = pl.BlockSpec((1, T, E), lambda b: (b, 0, 0))

    itemsize = jnp.dtype(hidden_states.dtype).itemsize
    # Weights are fetched exactly once (resident); activations once in/out.
    cost = pl.CostEstimate(
        flops=int(B * (8 * T * E * E + 4 * T * T * E)),
        transcendentals=int(B * H * T * T),
        bytes_accessed=int((2 * B * T * E + 4 * E * E + 4 * E) * itemsize),
    )

    return pl.pallas_call(
        kernel,
        out_shape=jax.ShapeDtypeStruct((B, T, E), hidden_states.dtype),
        grid_spec=pltpu.PrefetchScalarGridSpec(
            num_scalar_prefetch=0,
            grid=(B,),                                        # one step per batch element
            in_specs=[x_spec, wqkv_spec, bqkv_spec, wo_spec, bo_spec],
            out_specs=out_spec),
        compiler_params=pltpu.CompilerParams(
            dimension_semantics=("parallel",),
            vmem_limit_bytes=48 * 1024 * 1024),
        cost_estimate=cost,
    )(hidden_states, wqkv, bqkv, wo, bo)


def _reference(hidden_states, params, *, num_heads):
    """Pure-JAX reference mirroring the PyTorch forward (self-attn, no masks)."""
    B, T, E = hidden_states.shape
    D = E // num_heads
    scale = D ** (-0.5)
    x = hidden_states.astype(jnp.float32)

    def lin(x, w, b):
        return x @ w.astype(jnp.float32) + b.astype(jnp.float32)

    q = lin(x, params["wq"], params["bq"]) * scale
    k = lin(x, params["wk"], params["bk"])
    v = lin(x, params["wv"], params["bv"])

    def shape(t):  # (B,T,E) -> (B*H, T, D)
        return t.reshape(B, T, num_heads, D).transpose(0, 2, 1, 3).reshape(
            B * num_heads, T, D)

    q, k, v = shape(q), shape(k), shape(v)
    w = jnp.einsum("btd,bsd->bts", q, k)
    w = jax.nn.softmax(w, axis=-1)
    o = jnp.einsum("bts,bsd->btd", w, v)
    o = o.reshape(B, num_heads, T, D).transpose(0, 2, 1, 3).reshape(B, T, E)
    return lin(o, params["wo"], params["bo"]).astype(hidden_states.dtype)


if __name__ == "__main__":
    # config: hidden_size=32, num_attention_heads=4, attention_dropout=0.0
    B, T, E, H = 2, 8, 32, 4

    key = jax.random.PRNGKey(0)
    keys = jax.random.split(key, 10)
    init = lambda k, shape, s=0.05: (s * jax.random.normal(k, shape, jnp.float32))

    params = {
        "wq": init(keys[0], (E, E)), "bq": init(keys[1], (1, E)),
        "wk": init(keys[2], (E, E)), "bk": init(keys[3], (1, E)),
        "wv": init(keys[4], (E, E)), "bv": init(keys[5], (1, E)),
        "wo": init(keys[6], (E, E)), "bo": init(keys[7], (1, E)),
    }
    x = jax.random.normal(keys[8], (B, T, E), jnp.float32)

    out = clip_attention(x, params, num_heads=H)
    out = jax.block_until_ready(out)

    ref = _reference(x, params, num_heads=H)
    assert out.shape == (B, T, E)
    assert jnp.allclose(out, ref, atol=1e-3, rtol=1e-3), "mismatch vs reference"

    print("KERNEL_OK")
</pallas_src>

<mosaic_0001>
module attributes {stable_mosaic.version = 11 : i64} {
  func.func @_clip_attention_kernel(%arg0: i32, %arg1: memref<1x8x32xf32, #tpu.memory_space<vmem>>, %arg2: memref<32x96xf32, #tpu.memory_space<vmem>>, %arg3: memref<1x96xf32, #tpu.memory_space<vmem>>, %arg4: memref<32x32xf32, #tpu.memory_space<vmem>>, %arg5: memref<1x32xf32, #tpu.memory_space<vmem>>, %arg6: memref<1x8x32xf32, #tpu.memory_space<vmem>>) attributes {dimension_semantics = [#tpu.dimension_semantics<parallel>], iteration_bounds = array<i64: 2>, scalar_prefetch = 0 : i64, scratch_operands = 0 : i64, tpu.core_type = #tpu.core_type<tc>, window_params = [{transform_indices = @transform_0, window_bounds = array<i64: 1, 8, 32>}, {pipeline_mode = #tpu.pipeline_mode<synchronous>, transform_indices = @transform_1, window_bounds = array<i64: 32, 96>}, {pipeline_mode = #tpu.pipeline_mode<synchronous>, transform_indices = @transform_2, window_bounds = array<i64: 1, 96>}, {pipeline_mode = #tpu.pipeline_mode<synchronous>, transform_indices = @transform_3, window_bounds = array<i64: 32, 32>}, {pipeline_mode = #tpu.pipeline_mode<synchronous>, transform_indices = @transform_4, window_bounds = array<i64: 1, 32>}, {transform_indices = @transform_5, window_bounds = array<i64: 1, 8, 32>}]} {
    %c0 = arith.constant 0 : index
    %c0_0 = arith.constant 0 : index
    %c0_1 = arith.constant 0 : index
    %0 = vector.load %arg1[%c0, %c0_0, %c0_1] : memref<1x8x32xf32, #tpu.memory_space<vmem>>, vector<1x8x32xf32>
    %1 = vector.shape_cast %0 : vector<1x8x32xf32> to vector<8x32xf32>
    %c0_2 = arith.constant 0 : index
    %c0_3 = arith.constant 0 : index
    %2 = vector.load %arg2[%c0_2, %c0_3] : memref<32x96xf32, #tpu.memory_space<vmem>>, vector<32x96xf32>
    %cst = arith.constant dense<0.000000e+00> : vector<8x96xf32>
    %3 = tpu.matmul %1, %2, %cst {dimension_numbers = #tpu.dot_dimension_numbers<[1], [0], [0], [1], [0, 0, 1, 1], [], []>} : vector<8x32xf32>, vector<32x96xf32>, vector<8x96xf32> -> vector<8x96xf32>
    %c0_4 = arith.constant 0 : index
    %c0_5 = arith.constant 0 : index
    %4 = vector.load %arg3[%c0_4, %c0_5] : memref<1x96xf32, #tpu.memory_space<vmem>>, vector<1x96xf32>
    %5 = vector.broadcast %4 : vector<1x96xf32> to vector<8x96xf32>
    %6 = arith.addf %3, %5 : vector<8x96xf32>
    %7 = vector.extract_strided_slice %6 {offsets = [0, 0], sizes = [8, 32], strides = [1, 1]} : vector<8x96xf32> to vector<8x32xf32>
    %cst_6 = arith.constant 0.353553385 : f32
    %8 = vector.broadcast %cst_6 : f32 to vector<8x32xf32>
    %9 = arith.mulf %7, %8 : vector<8x32xf32>
    %10 = vector.extract_strided_slice %6 {offsets = [0, 32], sizes = [8, 32], strides = [1, 1]} : vector<8x96xf32> to vector<8x32xf32>
    %11 = vector.extract_strided_slice %6 {offsets = [0, 64], sizes = [8, 32], strides = [1, 1]} : vector<8x96xf32> to vector<8x32xf32>
    %12 = vector.extract_strided_slice %9 {offsets = [0, 0], sizes = [8, 8], strides = [1, 1]} : vector<8x32xf32> to vector<8x8xf32>
    %13 = vector.extract_strided_slice %10 {offsets = [0, 0], sizes = [8, 8], strides = [1, 1]} : vector<8x32xf32> to vector<8x8xf32>
    %14 = vector.extract_strided_slice %11 {offsets = [0, 0], sizes = [8, 8], strides = [1, 1]} : vector<8x32xf32> to vector<8x8xf32>
    %cst_7 = arith.constant dense<0.000000e+00> : vector<8x8xf32>
    %15 = tpu.matmul %12, %13, %cst_7 {dimension_numbers = #tpu.dot_dimension_numbers<[1], [1], [0], [0], [0, 0, 1, 0], [], []>} : vector<8x8xf32>, vector<8x8xf32>, vector<8x8xf32> -> vector<8x8xf32>
    %cst_8 = arith.constant dense<0xFF800000> : vector<8xf32>
    %16 = vector.multi_reduction <maximumf>, %15, %cst_8 [1] : vector<8x8xf32> to vector<8xf32>
    %17 = vector.shape_cast %16 : vector<8xf32> to vector<8x1xf32>
    %18 = vector.broadcast %17 : vector<8x1xf32> to vector<8x8xf32>
    %19 = arith.subf %15, %18 : vector<8x8xf32>
    %20 = math.exp %19 : vector<8x8xf32>
    %cst_9 = arith.constant dense<0.000000e+00> : vector<8xf32>
    %21 = vector.multi_reduction <add>, %20, %cst_9 [1] : vector<8x8xf32> to vector<8xf32>
    %22 = vector.shape_cast %21 : vector<8xf32> to vector<8x1xf32>
    %23 = vector.broadcast %22 : vector<8x1xf32> to vector<8x8xf32>
    %24 = arith.divf %20, %23 : vector<8x8xf32>
    %cst_10 = arith.constant dense<0.000000e+00> : vector<8x8xf32>
    %25 = tpu.matmul %24, %14, %cst_10 {dimension_numbers = #tpu.dot_dimension_numbers<[1], [0], [0], [1], [0, 0, 1, 1], [], []>} : vector<8x8xf32>, vector<8x8xf32>, vector<8x8xf32> -> vector<8x8xf32>
    %26 = vector.extract_strided_slice %9 {offsets = [0, 8], sizes = [8, 8], strides = [1, 1]} : vector<8x32xf32> to vector<8x8xf32>
    %27 = vector.extract_strided_slice %10 {offsets = [0, 8], sizes = [8, 8], strides = [1, 1]} : vector<8x32xf32> to vector<8x8xf32>
    %28 = vector.extract_strided_slice %11 {offsets = [0, 8], sizes = [8, 8], strides = [1, 1]} : vector<8x32xf32> to vector<8x8xf32>
    %cst_11 = arith.constant dense<0.000000e+00> : vector<8x8xf32>
    %29 = tpu.matmul %26, %27, %cst_11 {dimension_numbers = #tpu.dot_dimension_numbers<[1], [1], [0], [0], [0, 0, 1, 0], [], []>} : vector<8x8xf32>, vector<8x8xf32>, vector<8x8xf32> -> vector<8x8xf32>
    %cst_12 = arith.constant dense<0xFF800000> : vector<8xf32>
    %30 = vector.multi_reduction <maximumf>, %29, %cst_12 [1] : vector<8x8xf32> to vector<8xf32>
    %31 = vector.shape_cast %30 : vector<8xf32> to vector<8x1xf32>
    %32 = vector.broadcast %31 : vector<8x1xf32> to vector<8x8xf32>
    %33 = arith.subf %29, %32 : vector<8x8xf32>
    %34 = math.exp %33 : vector<8x8xf32>
    %cst_13 = arith.constant dense<0.000000e+00> : vector<8xf32>
    %35 = vector.multi_reduction <add>, %34, %cst_13 [1] : vector<8x8xf32> to vector<8xf32>
    %36 = vector.shape_cast %35 : vector<8xf32> to vector<8x1xf32>
    %37 = vector.broadcast %36 : vector<8x1xf32> to vector<8x8xf32>
    %38 = arith.divf %34, %37 : vector<8x8xf32>
    %cst_14 = arith.constant dense<0.000000e+00> : vector<8x8xf32>
    %39 = tpu.matmul %38, %28, %cst_14 {dimension_numbers = #tpu.dot_dimension_numbers<[1], [0], [0], [1], [0, 0, 1, 1], [], []>} : vector<8x8xf32>, vector<8x8xf32>, vector<8x8xf32> -> vector<8x8xf32>
    %40 = vector.extract_strided_slice %9 {offsets = [0, 16], sizes = [8, 8], strides = [1, 1]} : vector<8x32xf32> to vector<8x8xf32>
    %41 = vector.extract_strided_slice %10 {offsets = [0, 16], sizes = [8, 8], strides = [1, 1]} : vector<8x32xf32> to vector<8x8xf32>
    %42 = vector.extract_strided_slice %11 {offsets = [0, 16], sizes = [8, 8], strides = [1, 1]} : vector<8x32xf32> to vector<8x8xf32>
    %cst_15 = arith.constant dense<0.000000e+00> : vector<8x8xf32>
    %43 = tpu.matmul %40, %41, %cst_15 {dimension_numbers = #tpu.dot_dimension_numbers<[1], [1], [0], [0], [0, 0, 1, 0], [], []>} : vector<8x8xf32>, vector<8x8xf32>, vector<8x8xf32> -> vector<8x8xf32>
    %cst_16 = arith.constant dense<0xFF800000> : vector<8xf32>
    %44 = vector.multi_reduction <maximumf>, %43, %cst_16 [1] : vector<8x8xf32> to vector<8xf32>
    %45 = vector.shape_cast %44 : vector<8xf32> to vector<8x1xf32>
    %46 = vector.broadcast %45 : vector<8x1xf32> to vector<8x8xf32>
    %47 = arith.subf %43, %46 : vector<8x8xf32>
    %48 = math.exp %47 : vector<8x8xf32>
    %cst_17 = arith.constant dense<0.000000e+00> : vector<8xf32>
    %49 = vector.multi_reduction <add>, %48, %cst_17 [1] : vector<8x8xf32> to vector<8xf32>
    %50 = vector.shape_cast %49 : vector<8xf32> to vector<8x1xf32>
    %51 = vector.broadcast %50 : vector<8x1xf32> to vector<8x8xf32>
    %52 = arith.divf %48, %51 : vector<8x8xf32>
    %cst_18 = arith.constant dense<0.000000e+00> : vector<8x8xf32>
    %53 = tpu.matmul %52, %42, %cst_18 {dimension_numbers = #tpu.dot_dimension_numbers<[1], [0], [0], [1], [0, 0, 1, 1], [], []>} : vector<8x8xf32>, vector<8x8xf32>, vector<8x8xf32> -> vector<8x8xf32>
    %54 = vector.extract_strided_slice %9 {offsets = [0, 24], sizes = [8, 8], strides = [1, 1]} : vector<8x32xf32> to vector<8x8xf32>
    %55 = vector.extract_strided_slice %10 {offsets = [0, 24], sizes = [8, 8], strides = [1, 1]} : vector<8x32xf32> to vector<8x8xf32>
    %56 = vector.extract_strided_slice %11 {offsets = [0, 24], sizes = [8, 8], strides = [1, 1]} : vector<8x32xf32> to vector<8x8xf32>
    %cst_19 = arith.constant dense<0.000000e+00> : vector<8x8xf32>
    %57 = tpu.matmul %54, %55, %cst_19 {dimension_numbers = #tpu.dot_dimension_numbers<[1], [1], [0], [0], [0, 0, 1, 0], [], []>} : vector<8x8xf32>, vector<8x8xf32>, vector<8x8xf32> -> vector<8x8xf32>
    %cst_20 = arith.constant dense<0xFF800000> : vector<8xf32>
    %58 = vector.multi_reduction <maximumf>, %57, %cst_20 [1] : vector<8x8xf32> to vector<8xf32>
    %59 = vector.shape_cast %58 : vector<8xf32> to vector<8x1xf32>
    %60 = vector.broadcast %59 : vector<8x1xf32> to vector<8x8xf32>
    %61 = arith.subf %57, %60 : vector<8x8xf32>
    %62 = math.exp %61 : vector<8x8xf32>
    %cst_21 = arith.constant dense<0.000000e+00> : vector<8xf32>
    %63 = vector.multi_reduction <add>, %62, %cst_21 [1] : vector<8x8xf32> to vector<8xf32>
    %64 = vector.shape_cast %63 : vector<8xf32> to vector<8x1xf32>
    %65 = vector.broadcast %64 : vector<8x1xf32> to vector<8x8xf32>
    %66 = arith.divf %62, %65 : vector<8x8xf32>
    %cst_22 = arith.constant dense<0.000000e+00> : vector<8x8xf32>
    %67 = tpu.matmul %66, %56, %cst_22 {dimension_numbers = #tpu.dot_dimension_numbers<[1], [0], [0], [1], [0, 0, 1, 1], [], []>} : vector<8x8xf32>, vector<8x8xf32>, vector<8x8xf32> -> vector<8x8xf32>
    %68 = tpu.concatenate %25, %39, %53, %67 in 1 : vector<8x8xf32>, vector<8x8xf32>, vector<8x8xf32>, vector<8x8xf32> -> vector<8x32xf32>
    %c0_23 = arith.constant 0 : index
    %c0_24 = arith.constant 0 : index
    %69 = vector.load %arg4[%c0_23, %c0_24] : memref<32x32xf32, #tpu.memory_space<vmem>>, vector<32x32xf32>
    %cst_25 = arith.constant dense<0.000000e+00> : vector<8x32xf32>
    %70 = tpu.matmul %68, %69, %cst_25 {dimension_numbers = #tpu.dot_dimension_numbers<[1], [0], [0], [1], [0, 0, 1, 1], [], []>} : vector<8x32xf32>, vector<32x32xf32>, vector<8x32xf32> -> vector<8x32xf32>
    %c0_26 = arith.constant 0 : index
    %c0_27 = arith.constant 0 : index
    %71 = vector.load %arg5[%c0_26, %c0_27] : memref<1x32xf32, #tpu.memory_space<vmem>>, vector<1x32xf32>
    %72 = vector.broadcast %71 : vector<1x32xf32> to vector<8x32xf32>
    %73 = arith.addf %70, %72 : vector<8x32xf32>
    %c0_28 = arith.constant 0 : index
    %c0_29 = arith.constant 0 : index
    %c0_30 = arith.constant 0 : index
    %74 = vector.load %arg6[%c0_28, %c0_29, %c0_30] : memref<1x8x32xf32, #tpu.memory_space<vmem>>, vector<1x8x32xf32>
    %75 = vector.shape_cast %74 : vector<1x8x32xf32> to vector<8x32xf32>
    %76 = vector.shape_cast %73 : vector<8x32xf32> to vector<1x8x32xf32>
    tpu.vector_store %arg6[%c0_28, %c0_29, %c0_30], %76 {strides = array<i32>} : memref<1x8x32xf32, #tpu.memory_space<vmem>>, vector<1x8x32xf32>,
    return
  }
  func.func @transform_0(%arg0: i32) -> (i32, i32, i32) {
    %c0_i32 = arith.constant 0 : i32
    %c0_i32_0 = arith.constant 0 : i32
    %c0_i32_1 = arith.constant 0 : i32
    return %arg0, %c0_i32, %c0_i32_0 : i32, i32, i32
  }
  func.func @transform_1(%arg0: i32) -> (i32, i32) {
    %c0_i32 = arith.constant 0 : i32
    %c0_i32_0 = arith.constant 0 : i32
    %c0_i32_1 = arith.constant 0 : i32
    return %c0_i32, %c0_i32_0 : i32, i32
  }
  func.func @transform_2(%arg0: i32) -> (i32, i32) {
    %c0_i32 = arith.constant 0 : i32
    %c0_i32_0 = arith.constant 0 : i32
    %c0_i32_1 = arith.constant 0 : i32
    return %c0_i32, %c0_i32_0 : i32, i32
  }
  func.func @transform_3(%arg0: i32) -> (i32, i32) {
    %c0_i32 = arith.constant 0 : i32
    %c0_i32_0 = arith.constant 0 : i32
    %c0_i32_1 = arith.constant 0 : i32
    return %c0_i32, %c0_i32_0 : i32, i32
  }
  func.func @transform_4(%arg0: i32) -> (i32, i32) {
    %c0_i32 = arith.constant 0 : i32
    %c0_i32_0 = arith.constant 0 : i32
    %c0_i32_1 = arith.constant 0 : i32
    return %c0_i32, %c0_i32_0 : i32, i32
  }
  func.func @transform_5(%arg0: i32) -> (i32, i32, i32) {
    %c0_i32 = arith.constant 0 : i32
    %c0_i32_0 = arith.constant 0 : i32
    %c0_i32_1 = arith.constant 0 : i32
    return %arg0, %c0_i32, %c0_i32_0 : i32, i32, i32
  }
}

</mosaic_0001>

<bundles_post_ra>
// kernel: tpu_custom_call.1
= control target key start
LH: loop header
LB: loop body
LE: loop exit
PB: predicated region body
PF: predicated region fallthrough
CT: control target
= control target key end

     0   :  { %10 = vsyncpa [#allocation3], 0  ;;  %s1326_s0 = inlined_call_operand.hbm [shape: f32[2,8,32], index: 0, kind: input, shape index: {}]   ;;  %s1327_s1 = inlined_call_operand.hbm [shape: f32[32,96], index: 1, kind: input, shape index: {}]   ;;  %s1328_s2 = inlined_call_operand.vmem [shape: f32[1,96], index: 2, kind: input, shape index: {}]   ;;  %s1329_s3 = inlined_call_operand.hbm [shape: f32[32,32], index: 3, kind: input, shape index: {}]   ;;  %s1330_s4 = inlined_call_operand.vmem [shape: f32[1,32], index: 4, kind: input, shape index: {}]   ;;  %s1331_s5 = inlined_call_operand.hbm [shape: f32[2,8,32], index: 5, kind: output, shape index: {}]  }
   0x1   :  { %12 = vsyncpa [#allocation3 + $0x1], 0 }
   0x2   :  { %13 = vsyncpa [#allocation6], 0 }
   0x3   :  { %14 = vsyncpa [#allocation4], 0 }
   0x4   :  { %16 = vsyncpa [#allocation4 + $0x1], 0  ;;  %s1117_s18 = smov 0   ;;  %s1119_s19 = smov 0  }
   0x5   :  { %s1121_s20 = smov 0   ;;  %s1123_s21 = smov 0  }
   0x6 LB: > { %s174_s24 = sshll.u32 %s1327_s1, 4  ;;  %s1141_s25 = sadd.s32 4294967295, %s1067_s21   ;;  %s1067_s21 = sphi %s1123_s21, %s1342_s21   ;;  %s1063_s20 = sphi %s1121_s20, %s1341_s20   ;;  %s1059_s19 = sphi %s1119_s19, %s1340_s19   ;;  %s1055_s18 = sphi %s1117_s18, %s1339_s18   ;;  %s175_s24 = int_to_ptr.hbm [resolvable:$true] %s174_s24 }
   0x7   : > { %p777_p0 = scmp.ge.s32.totalorder %s1067_s21, 1  ;;  %p43_p1 = scmp.eq.s32.totalorder %s1141_s25, 0 }
   0x8   : > { %p163_p2 = scmp.lt.s32.totalorder %s1067_s21, 3  ;;  %s1069_s27 = smov [#allocation5]  }
   0x9   : > { %s176_s28 = sshll.u32 %s1069_s27, 4  ;;  %s191_s6 = sshll.u32 %s1329_s3, 4  ;;  %s177_s28 = int_to_ptr.vmem [resolvable:$true] %s176_s28  ;;  %s192_s6 = int_to_ptr.hbm [resolvable:$true] %s191_s6 }
   0xa   : > { %p1146_p3 = pnand %p777_p0, %p163_p2  ;;  %s1070_s7 = smov [#allocation7]  }
   0xb   : > { %s193_s8 = sshll.u32 %s1070_s7, 4  ;;  %s1071_s9 = smov 128   ;;  %s194_s8 = int_to_ptr.vmem [resolvable:$true] %s193_s8 }
   0xc   : > { %p818_p4 = pneg %p1146_p3  ;;  %s1072_s10 = smov 8  }
   0xd   : > { %s776_s11 = sadd.s32 4294967294, %s1067_s21   ;;  %s1160_s12 = sadd.s32 1, %s1067_s21  }
   0xe   : > { %p819_p6 = pnand %p818_p4, %p43_p1  ;;  %s26_s13 = ssub.s32 %s1067_s21, %s1160_s12 }
   0xf   : > { %s29_s14 = sadd.s32 1, %s1063_s20  ;;  %p27_p7 = scmp.eq.s32.totalorder %s26_s13, 0 }
  0x10   : > { %821 = dma.hbm_to_vmem [thread:$0]  (!%p819_p6), %s175_s24, 512, %s177_s28, [#allocation6], %s1071_s9, %s1071_s9, %s1072_s10  }
  0x11   : > { %824 = dma.hbm_to_vmem [thread:$0]  (!%p819_p6), %s192_s6, 512, %s194_s8, [#allocation6], %s1071_s9, %s1071_s9, %s1072_s10  }
  0x12   : > { %p36_p8 = scmp.ne.s32.totalorder %s1063_s20, %s1059_s19  ;;  %p37_p9 = scmp.eq.s32.totalorder %s1067_s21, 0 }
  0x13   : > { %p42_p10 = scmp.ne.s32.totalorder %s1059_s19, %s1055_s18  ;;  %p150_p13 = scmp.eq.s32.totalorder %s1141_s25, 1 }
  0x14   : > { %s1171_s15 = scalar_select %p27_p7, %s1063_s20, %s29_s14  }
  0x15   : > { %p1173_p11 = por %p37_p9, %p36_p8  ;;  %p1179_p12 = por %p43_p1, %p42_p10 }
  0x16   : > { %p156_p0 = scmp.eq.s32.totalorder %s776_s11, 1  ;;  %p835_p2 = scmp.lt.s32.totalorder %s1067_s21, 2 }
  0x17   : > { %s210_s22 = sand.u32 1, %s1063_s20   ;;  %p1186_p4 = por %p150_p13, %p36_p8 }
  0x18   : > { %p1190_p6 = por %p156_p0, %p42_p10  ;;  %s781_s27 = sshll.u32 %s210_s22, 3 }
  0x19   : > { %s782_s28 = sshll.u32 %s1067_s21, 3  ;;  %s214_s7 = scalar_lea.vmem [#allocation2], %s781_s27 }
  0x1a   : > { %s218_s6 = scalar_lea.hbm %s1326_s0, %s782_s28  ;;  %s222_s8 = sshll.u32 %s214_s7, 4  ;;  %s223_s8 = int_to_ptr.vmem [resolvable:$true] %s222_s8 }
  0x1b   : > { %s220_s9 = sshll.u32 %s218_s6, 4  ;;  %p1200_p7 = pnand %p835_p2, %p1173_p11  ;;  %s221_s9 = int_to_ptr.hbm [resolvable:$true] %s220_s9 }
  0x1c   : > { %s211_s11 = scalar_lea.sflag [#allocation3], %s210_s22  ;;  %s967_s13 = sshra.s32 %s221_s9, 4  ;;  %s968_s13 = int_to_ptr.hbm [resolvable:$true] %s967_s13 }
  0x1d   : > { %s969_s14 = scalar_lea.hbm %s968_s13, 8  ;;  %p971_p9 = pneg %p1200_p7 }
  0x1e   : > { %p970_p8 = scmp.ne.s32.totalorder %s968_s13, %s969_s14  ;;  %s974_s29 = scalar_lea.hbm %s1326_s0, 16 }
  0x1f   : > { %p975_p11 = scmp.lt.s32.totalorder %s968_s13, %s1326_s0  ;;  %p976_p0 = scmp.lt.s32.totalorder %s974_s29, %s969_s14 }
  0x20   : > { %p972_p10 = pnand %p971_p9, %p970_p8 }
  0x21   : > { %p977_p2 = por %p976_p0, %p975_p11 }
  0x22   : > { %p973_p13 = pneg %p972_p10 }
  0x24   : > { %p978_p5 = pnand %p977_p2, %p973_p13 }
  0x26   : > { %981 = shalt.err (!%p978_p5)
}
  0x27   : > { %828 = dma.hbm_to_vmem [thread:$0]  (!%p1200_p7), %s221_s9, 128, %s223_s8, %s211_s11  }
  0x28   : > { %231 = sbr.rel (%p1146_p3) target bundleno = 1100 (0x44c), region = 40  ;;  %s1217_s22 = sand.u32 (!%p1146_p3), 1, %s1059_s19  }
  0x29   : > { %s784_s6 = sshll.u32 (!%p1146_p3), %s1217_s22, 3  ;;  %s234_s7 = scalar_lea.sflag (!%p1146_p3), [#allocation3], %s1217_s22 }
  0x2a   : > { %s237_s13 = scalar_lea.vmem (!%p1146_p3), [#allocation2], %s784_s6 }
  0x2d   : > { %1042 = dma.done.wait (%p1179_p12), %s234_s7, 128  }
  0x2e   : > { %1044 = vsyncadd (%p1179_p12), %s234_s7, 4294967168 }
  0x2f   : > { %1046 = dma.done.wait (%p43_p1), [#allocation6], 1024  }
  0x30   : > { %1048 = vsyncadd (%p43_p1), [#allocation6], 4294966272  ;;  %v279_v0 = vld [vmem:[#allocation5 + $0x18] sm:$0xff]  ;;  %v278_v1 = vld [vmem:[#allocation5 + $0x10] sm:$0xff]  ;;  %vm284_vm0 = vcmask 261120   ;;  %s1073_s8 = smov 72  }
  0x31   : > { %300 = vmatpush.msra.mxu0 %v279_v0  ;;  %v277_v2 = vld [vmem:[#allocation5 + $0x8] sm:$0xff]  ;;  %v276_v3 = vld [vmem:[#allocation5] sm:$0xff]  ;;  %v275_v4 = vld [vmem:[%s237_s13] sm:$0xff]  ;;  %s1074_s9 = smov 96   ;;  %s1075_s10 = smov 120   ;;  %vm312_vm1 = vcmask 64512  }
  0x32   : > { %v889_v5 = vld [vmem:[%s1328_s2] ss:$0 sm:$0xff]  ;;  %s1076_s11 = smov 88   ;;  %s1077_s14 = smov 112  }
  0x33   : > { %301 = vmatpush.msra.mxu0 %v278_v1  ;;  %s1078_s27 = smov 80   ;;  %s1079_s28 = smov 104  }
  0x34   : > { %s1080_s29 = smov 56   ;;  %s1081_s30 = smov 40  }
  0x35   : > { %302 = vmatpush.msra.mxu0 %v277_v2  ;;  %s1082_s16 = smov 64   ;;  %s1083_s7 = smov 48  }
  0x36   : > { %s1084_s13 = smov 8   ;;  %s1085_s26 = smov 24  }
  0x37   : > { %303 = vmatpush.msra.mxu0 %v276_v3  ;;  %s1086_s17 = smov 16  }
  0x38   : > { %788 = vmatmul.msk.f32.vlgmr.msra.gmra.mxu0 %vm284_vm0, %v275_v4 }
  0xb5   : > { %v305_v6 = vpop.f32.mrf.mxu0 }
  0xb6   : > { %v1235_v7 = vadd.f32 %v889_v5, %v305_v6 }
  0xb8   : > { %546 = vrot.lane.b32.xlu2 %v1235_v7, %s1073_s8  ;;  %310 = vrot.lane.b32.xlu0 %v1235_v7, %s1074_s9  ;;  %v308_v8 = vmul.f32 0.35355338, %v1235_v7  ;;  %s803_s8 = sshll.u32 %s1141_s25, 3  ;;  %s672_s25 = scalar_lea.sflag [#allocation4], %s1217_s22 }
  0xba   : > { %388 = vrot.lane.b32.xlu1 %v308_v8, %s1075_s10 }
  0xc0   : > { %390 = vrot.lane.b32.xlu0 %v1235_v7, %s1076_s11  ;;  %466 = vrot.lane.b32.xlu2 %v308_v8, %s1077_s14  ;;  %s682_s11 = scalar_lea.hbm %s1331_s5, %s803_s8 }
  0xc2   : > { %468 = vrot.lane.b32.xlu1 %v1235_v7, %s1078_s27 }
  0xc8   : > { %544 = vrot.lane.b32.xlu0 %v308_v8, %s1079_s28  ;;  %s274_s28 = scalar_lea.vmem [#allocation8], %s784_s6  ;;  %s1017_s6 = scalar_lea.hbm %s1331_s5, 16 }
 0x112   : > { %v547_v9 = vpop.permute.xlu2 %546 }
 0x113   : > { %798 = vmatpush.xpose.msk.msrb.mxu0 %vm312_vm1, %v547_v9 }
 0x11a   : > { %v467_v14 = vpop.permute.xlu2 %466 }
 0x12a   : > { %v311_v10 = vpop.permute.xlu0 %310 }
 0x12b   : > { %789 = vmatpush.xpose.msk.msra.mxu1 %vm312_vm1, %v311_v10 }
 0x12c   : > { %v389_v11 = vpop.permute.xlu1 %388 }
 0x12e   : > { %790 = vmatmul.msk.f32.vlgmr.msra.gmra.mxu1 %vm312_vm1, %v308_v8 }
 0x132   : > { %v391_v12 = vpop.permute.xlu0 %390 }
 0x133   : > { %792 = vmatpush.xpose.msk.msra.mxu3 %vm312_vm1, %v391_v12 }
 0x134   : > { %v469_v13 = vpop.permute.xlu1 %468 }
 0x135   : > { %795 = vmatpush.xpose.msk.msrb.mxu1 %vm312_vm1, %v469_v13 }
 0x136   : > { %793 = vmatmul.msk.f32.vlgmr.msra.gmra.mxu3 %vm312_vm1, %v389_v11 }
 0x138   : > { %796 = vmatmul.msk.f32.vlgmr.msrb.gmra.mxu1 %vm312_vm1, %v467_v14 }
 0x13a   : > { %v545_v15 = vpop.permute.xlu0 %544 }
 0x13b   : > { %799 = vmatmul.msk.f32.vlgmr.msrb.gmra.mxu0 %vm312_vm1, %v545_v15 }
 0x1ab   : > { %v335_v16 = vpop.f32.mrf.mxu1 }
 0x1ac   : > { %v338_v17 = vsel %vm312_vm1, %v335_v16, -inf }
 0x1ad   : > { %339 = vmax.xlane.f32.xlu1 %v338_v17 }
 0x1b5   : > { %v491_v18 = vpop.f32.mrf.mxu1 }
 0x1b6   : > { %v494_v19 = vsel %vm312_vm1, %v491_v18, -inf }
 0x1b7   : > { %495 = vmax.xlane.f32.xlu0 %v494_v19 }
 0x1b8   : > { %v569_v22 = vpop.f32.mrf.mxu0 }
 0x1b9   : > { %v413_v20 = vpop.f32.mrf.mxu3  ;;  %v572_v23 = vsel %vm312_vm1, %v569_v22, -inf }
 0x1ba   : > { %v416_v21 = vsel %vm312_vm1, %v413_v20, -inf }
 0x1bb   : > { %417 = vmax.xlane.f32.xlu2 %v416_v21 }
 0x1c3   : > { %573 = vmax.xlane.f32.xlu2 %v572_v23 }
 0x1cb   : > { %440 = vrot.lane.b32.xlu0 %v1235_v7, %s1080_s29  ;;  %s684_s29 = sshll.u32 %s274_s28, 4  ;;  %s685_s29 = int_to_ptr.vmem [resolvable:$true] %s684_s29 }
 0x220   : > { %v340_v24 = vpop.xlane.xlu1 %339 }
 0x221   : > { %v341_v25 = vsub.f32 %v335_v16, %v340_v24 }
 0x223   : > { %v342_v26 = vmul.f32 1.442695, %v341_v25 }
 0x225   : > { %891 = vpow2.f32 %v342_v26 }
 0x22a   : > { %v496_v27 = vpop.xlane.xlu0 %495 }
 0x22b   : > { %v892_v28 = vpop.eup %891  ;;  %v497_v29 = vsub.f32 %v491_v18, %v496_v27 }
 0x22c   : > { %v344_v30 = vsel %vm312_vm1, %v892_v28, 0.0 }
 0x22d   : > { %v498_v31 = vmul.f32 1.442695, %v497_v29  ;;  %345 = vadd.xlane.f32.xlu1 %v344_v30 }
 0x22e   : > { %v418_v32 = vpop.xlane.xlu2 %417 }
 0x22f   : > { %893 = vpow2.f32 %v498_v31  ;;  %v419_v33 = vsub.f32 %v413_v20, %v418_v32 }
 0x231   : > { %v420_v34 = vmul.f32 1.442695, %v419_v33 }
 0x233   : > { %895 = vpow2.f32 %v420_v34 }
 0x235   : > { %v1256_v35 = vpop.eup %893 }
 0x236   : > { %v574_v36 = vpop.xlane.xlu2 %573  ;;  %v500_v37 = vsel %vm312_vm1, %v1256_v35, 0.0 }
 0x237   : > { %v575_v38 = vsub.f32 %v569_v22, %v574_v36  ;;  %501 = vadd.xlane.f32.xlu0 %v500_v37  ;;  %v642_v37 = vld [vmem:[#allocation7 + $0x18] sm:$0xff] }
 0x238   : > { %662 = vmatpush.msra.mxu1 %v642_v37 }
 0x239   : > { %v1260_v39 = vpop.eup %895  ;;  %v576_v40 = vmul.f32 1.442695, %v575_v38  ;;  %v641_v38 = vld [vmem:[#allocation7 + $0x10] sm:$0xff] }
 0x23a   : > { %v422_v41 = vsel %vm312_vm1, %v1260_v39, 0.0  ;;  %663 = vmatpush.msra.mxu1 %v641_v38 }
 0x23b   : > { %897 = vpow2.f32 %v576_v40  ;;  %423 = vadd.xlane.f32.xlu2 %v422_v41 }
 0x23d   : > { %v441_v45 = vpop.permute.xlu0 %440 }
 0x241   : > { %v1264_v42 = vpop.eup %897 }
 0x242   : > { %v578_v43 = vsel %vm312_vm1, %v1264_v42, 0.0 }
 0x243   : > { %579 = vadd.xlane.f32.xlu1 %v578_v43 }
 0x24b   : > { %596 = vrot.lane.b32.xlu0 %v1235_v7, %s1081_s30  ;;  %s686_s30 = sshll.u32 %s682_s11, 4  ;;  %s687_s30 = int_to_ptr.hbm [resolvable:$true] %s686_s30 }
 0x253   : > { %362 = vrot.lane.b32.xlu2 %v1235_v7, %s1082_s16  ;;  %s1011_s16 = sshra.s32 %s687_s30, 4  ;;  %s1012_s16 = int_to_ptr.hbm [resolvable:$true] %s1011_s16 }
 0x254   : > { %p1018_p12 = scmp.lt.s32.totalorder %s1012_s16, %s1331_s5 }
 0x25c   : > { %518 = vrot.lane.b32.xlu1 %v1235_v7, %s1083_s7  ;;  %s1013_s7 = scalar_lea.hbm %s1012_s16, 8 }
 0x25d   : > { %p1014_p1 = scmp.ne.s32.totalorder %s1012_s16, %s1013_s7  ;;  %p1019_p7 = scmp.lt.s32.totalorder %s1017_s6, %s1013_s7 }
 0x25f   : > { %p1015_p3 = pnand %p1014_p1, %p1186_p4  ;;  %p1020_p8 = por %p1019_p7, %p1018_p12 }
 0x261   : > { %p1016_p5 = pneg %p1015_p3 }
 0x263   : > { %p1021_p9 = pnand %p1020_p8, %p1016_p5 }
 0x2a0   : > { %v346_v44 = vpop.xlane.xlu1 %345 }
 0x2a1   : > { %899 = vrcp.f32 %v346_v44  ;;  %v358_v51 = vand.u32 2147483648, %v346_v44  ;;  %vm352_vm3 = vweird.f32 %v346_v44  ;;  %v356_v54 = vand.u32 2147483647, %v346_v44 }
 0x2a3   : > { %v359_v56 = vor.u32 1.1754944e-38, %v358_v51  ;;  %vm357_vm5 = vcmp.eq.f32.partialorder %v356_v54, 8.507059e+37 }
 0x2a7   : > { %v900_v46 = vpop.eup %899 }
 0x2a8   : > { %v348_v47 = vmul.f32 %v900_v46, %v346_v44  ;;  %vm353_vm2 = vweird.f32 %v900_v46 }
 0x2a9   : > { %vm354_vm4 = vmor %vm352_vm3, %vm353_vm2 }
 0x2aa   : > { %v349_v48 = vsub.f32 1.0, %v348_v47  ;;  %v1271_v49 = vpop.xlane.xlu0 %501 }
 0x2ab   : > { %901 = vrcp.f32 %v1271_v49  ;;  %v514_v21 = vand.u32 2147483648, %v1271_v49  ;;  %vm508_vm14 = vweird.f32 %v1271_v49  ;;  %v512_v23 = vand.u32 2147483647, %v1271_v49 }
 0x2ac   : > { %v350_v50 = vmul.f32 %v900_v46, %v349_v48 }
 0x2ad   : > { %vm513_vm3 = vcmp.eq.f32.partialorder %v512_v23, 8.507059e+37 }
 0x2ae   : > { %v424_v52 = vpop.xlane.xlu2 %423  ;;  %v351_v53 = vadd.f32 %v900_v46, %v350_v50 }
 0x2af   : > { %903 = vrcp.f32 %v424_v52  ;;  %v436_v2 = vand.u32 2147483648, %v424_v52  ;;  %v434_v4 = vand.u32 2147483647, %v424_v52  ;;  %vm430_vm7 = vweird.f32 %v424_v52 }
 0x2b0   : > { %v355_v55 = vsel %vm354_vm4, %v900_v46, %v351_v53  ;;  %vm635_vm4 = vcmask 130048   ;;  %v890_v46 = vld [vmem:[%s1330_s4] ss:$0 sm:$0xff] }
 0x2b1   : > { %v360_v57 = vsel %vm357_vm5, %v359_v56, %v355_v55  ;;  %v902_v58 = vpop.eup %901  ;;  %v437_v8 = vor.u32 1.1754944e-38, %v436_v2  ;;  %vm435_vm9 = vcmp.eq.f32.partialorder %v434_v4, 8.507059e+37  ;;  %vm637_vm5 = vcmask 195584  }
 0x2b2   : > { %v361_v63 = vmul.f32 %v892_v28, %v360_v57  ;;  %v504_v0 = vmul.f32 %v902_v58, %v1271_v49  ;;  %vm509_vm11 = vweird.f32 %v902_v58  ;;  %v515_v28 = vor.u32 1.1754944e-38, %v514_v21 }
 0x2b3   : > { %vm510_vm2 = vmor %vm508_vm14, %vm509_vm11 }
 0x2b4   : > { %v505_v5 = vsub.f32 1.0, %v504_v0 }
 0x2b5   : > { %v904_v59 = vpop.eup %903 }
 0x2b6   : > { %v426_v60 = vmul.f32 %v904_v59, %v424_v52  ;;  %v363_v61 = vpop.permute.xlu2 %362  ;;  %v580_v62 = vpop.xlane.xlu1 %579  ;;  %vm431_vm6 = vweird.f32 %v904_v59  ;;  %v506_v13 = vmul.f32 %v902_v58, %v505_v5 }
 0x2b7   : > { %905 = vrcp.f32 %v580_v62  ;;  %383 = vmatpush.msra.mxu2 %v363_v61  ;;  %vm432_vm8 = vmor %vm430_vm7, %vm431_vm6  ;;  %v592_v16 = vand.u32 2147483648, %v580_v62  ;;  %v590_v18 = vand.u32 2147483647, %v580_v62  ;;  %vm586_vm12 = vweird.f32 %v580_v62 }
 0x2b8   : > { %v427_v1 = vsub.f32 1.0, %v426_v60  ;;  %791 = vmatmul.msk.f32.vlgmr.msra.gmra.mxu2 %vm312_vm1, %v361_v63  ;;  %v507_v19 = vadd.f32 %v902_v58, %v506_v13 }
 0x2b9   : > { %461 = vmatpush.msrb.mxu2 %v441_v45  ;;  %v593_v22 = vor.u32 1.1754944e-38, %v592_v16  ;;  %vm591_vm15 = vcmp.eq.f32.partialorder %v590_v18, 8.507059e+37 }
 0x2ba   : > { %v428_v3 = vmul.f32 %v904_v59, %v427_v1  ;;  %v511_v27 = vsel %vm510_vm2, %v902_v58, %v507_v19 }
 0x2bb   : > { %v516_v29 = vsel %vm513_vm3, %v515_v28, %v511_v27 }
 0x2bc   : > { %v429_v6 = vadd.f32 %v904_v59, %v428_v3  ;;  %v517_v31 = vmul.f32 %v1256_v35, %v516_v29  ;;  %v639_v35 = vld [vmem:[#allocation7] sm:$0xff] }
 0x2bd   : > { %v906_v7 = vpop.eup %905  ;;  %v597_v9 = vpop.permute.xlu0 %596 }
 0x2be   : > { %v582_v10 = vmul.f32 %v906_v7, %v580_v62  ;;  %617 = vmatpush.msra.mxu2 %v597_v9  ;;  %v433_v11 = vsel %vm432_vm8, %v904_v59, %v429_v6  ;;  %vm587_vm10 = vweird.f32 %v906_v7 }
 0x2bf   : > { %v438_v12 = vsel %vm435_vm9, %v437_v8, %v433_v11  ;;  %vm588_vm13 = vmor %vm586_vm12, %vm587_vm10 }
 0x2c0   : > { %v583_v14 = vsub.f32 1.0, %v582_v10  ;;  %v439_v15 = vmul.f32 %v1260_v39, %v438_v12  ;;  %v640_v39 = vld [vmem:[#allocation7 + $0x8] sm:$0xff] }
 0x2c1   : > { %664 = vmatpush.msra.mxu1 %v640_v39 }
 0x2c2   : > { %v584_v17 = vmul.f32 %v906_v7, %v583_v14  ;;  %794 = vmatmul.msk.f32.vlgmr.msrb.gmra.mxu2 %vm312_vm1, %v439_v15 }
 0x2c3   : > { %665 = vmatpush.msra.mxu1 %v639_v35 }
 0x2c4   : > { %v585_v20 = vadd.f32 %v906_v7, %v584_v17 }
 0x2c6   : > { %v589_v24 = vsel %vm588_vm13, %v906_v7, %v585_v20 }
 0x2c7   : > { %v594_v25 = vsel %vm591_vm15, %v593_v22, %v589_v24 }
 0x2c8   : > { %v595_v26 = vmul.f32 %v1264_v42, %v594_v25 }
 0x2ca   : > { %800 = vmatmul.msk.f32.vlgmr.msra.gmra.mxu2 %vm312_vm1, %v595_v26 }
 0x2ce   : > { %v519_v30 = vpop.permute.xlu1 %518 }
 0x2cf   : > { %539 = vmatpush.msrb.mxu3 %v519_v30 }
 0x2d0   : > { %797 = vmatmul.msk.f32.vlgmr.msrb.gmra.mxu3 %vm312_vm1, %v517_v31 }
 0x33b   : > { %v385_v32 = vpop.f32.mrf.mxu2 }
 0x345   : > { %v463_v33 = vpop.f32.mrf.mxu2 }
 0x346   : > { %623 = vrot.lane.b32.xlu2 %v463_v33, %s1084_s13 }
 0x34d   : > { %v619_v34 = vpop.f32.mrf.mxu2 }
 0x34e   : > { %631 = vrot.lane.b32.xlu0 %v619_v34, %s1085_s26 }
 0x353   : > { %v541_v36 = vpop.f32.mrf.mxu3 }
 0x354   : > { %627 = vrot.lane.b32.xlu1 %v541_v36, %s1086_s17 }
 0x3a0   : > { %v624_v40 = vpop.permute.xlu2 %623 }
 0x3a1   : > { %v634_v41 = vsel %vm312_vm1, %v385_v32, %v624_v40 }
 0x3c0   : > { %v632_v43 = vpop.permute.xlu0 %631 }
 0x3c6   : > { %v628_v42 = vpop.permute.xlu1 %627 }
 0x3c7   : > { %v636_v44 = vsel %vm635_vm4, %v634_v41, %v628_v42 }
 0x3c8   : > { %v638_v45 = vsel %vm637_vm5, %v636_v44, %v632_v43 }
 0x3c9   : > { %801 = vmatmul.msk.f32.vlgmr.msra.gmra.mxu1 %vm284_vm0, %v638_v45 }
 0x446   : > { %v667_v47 = vpop.f32.mrf.mxu1 }
 0x447   : > { %v668_v48 = vadd.f32 %v890_v46, %v667_v47 }
 0x449   : > { %670 = vst.msk [vmem:[%s274_s28] sm:$0xff] %vm284_vm0, %v668_v48 }
 0x44a   : > { %1024 = shalt.err (!%p1021_p9)
}
 0x44b   : > { %816 = dma.vmem_to_hbm [thread:$0]  (%p1186_p4), %s685_s29, 128, %s687_s30, %s672_s25  }
 0x44c PF: > { %s698_s22 = sand.u32 1, %s1055_s18   ;;  %p1338_p10 = scmp.ge.s32.totalorder %s1067_s21, 2 }
 0x44d   : > { %s699_s9 = scalar_lea.sflag [#allocation4], %s698_s22 }
 0x44e   : > { %p830_p13 = pnand %p1338_p10, %p1190_p6 }
 0x450   : > { %p831_p11 = pneg %p830_p13 }
 0x452   : > { %1050 = dma.done.wait (%p831_p11), %s699_s9, 128  }
 0x453   : > { %1052 = vsyncadd (%p831_p11), %s699_s9, 4294967168  ;;  %p19_p0 = scmp.ge.s32.totalorder %s1160_s12, 4   ;;  %s1339_s18 = smov %s1059_s19 }
 0x454   : > { %s1340_s19 = smov %s1063_s20  ;;  %s1341_s20 = smov %s1171_s15 }
 0x455   : > { %s1342_s21 = smov %s1160_s12  ;;  %21 = sbr.rel (!%p19_p0) target bundleno = 6 (0x6), region = 93 }
 0x45a   :  { %705 = vsyncpa [#allocation3], 1 }
 0x45b   :  { %707 = vsyncpa [#allocation3 + $0x1], 1 }
 0x45c   :  { %708 = vsyncpa [#allocation6], 1 }
 0x45d   :  { %709 = vsyncpa [#allocation4], 1 }
 0x45e   :  { %711 = vsyncpa [#allocation4 + $0x1], 1 }

</bundles_post_ra>
